<compile_context>
chip_gen: v7x
topology: tpu7x:2x2x1
jax: 0.10.0
libtpu: 0.0.40
codegen_flags: <defaults>
</compile_context>

<pallas_src>
import functools

import jax
import jax.numpy as jnp
import numpy as np
from jax.experimental import pallas as pl
from jax.experimental.pallas import tpu as pltpu

LANE = 128                               # MXU / lane width; all dims padded to this
VMEM_LIMIT_BYTES = 48 * 1024 * 1024      # raises v5e/v6e scoped default, fits v7x 64 MiB
Z_RESIDENT_BUDGET = 8 * 1024 * 1024      # keep Z_neigh loop-invariant if it fits here


def _round_up(n, m):
    return (n + m - 1) // m * m


def _pad2d(x, rows, cols):
    r, c = x.shape
    return jnp.pad(x, ((0, rows - r), (0, cols - c)))


def _fit_tile(dim, pref):
    """Largest multiple of LANE that divides `dim` (LANE-aligned) and is <= pref."""
    assert dim % LANE == 0 and dim >= LANE
    t = min(pref, dim)
    t -= t % LANE
    while dim % t:
        t -= LANE
    return t


def _pick_tile_m(n_dst_p):
    """Prefer >= 2 dst tiles so the 'parallel' axis can shard across v7x's 2 TCs."""
    for tm in (256, 128, 64):
        if n_dst_p % tm == 0 and n_dst_p // tm >= 2:
            return tm
    return min(n_dst_p, 256)


# ------------------ projection kernel: Z_neigh = H_src @ W_neigh ------------------

def _proj_kernel(x_ref, w_ref, o_ref, acc_ref):
    k = pl.program_id(2)

    @pl.when(k == 0)
    def _():
        acc_ref[...] = jnp.zeros_like(acc_ref)

    acc_ref[...] += jnp.dot(x_ref[...], w_ref[...],
                            preferred_element_type=jnp.float32)

    @pl.when(k == pl.num_programs(2) - 1)
    def _():
        o_ref[...] = acc_ref[...].astype(o_ref.dtype)


def proj_matmul(x, w, *, out_dtype, tile_m=256, tile_n=512, tile_k=512):
    """Tiled Z = X @ W (no bias). Rows/cols 'parallel', fin reduction 'arbitrary'."""
    n, fin = x.shape
    fin2, fout = w.shape
    assert fin == fin2
    tm, tn, tk = _fit_tile(n, tile_m), _fit_tile(fout, tile_n), _fit_tile(fin, tile_k)
    return pl.pallas_call(
        _proj_kernel,
        out_shape=jax.ShapeDtypeStruct((n, fout), out_dtype),
        grid_spec=pltpu.PrefetchScalarGridSpec(
            num_scalar_prefetch=0,
            grid=(n // tm, fout // tn, fin // tk),
            in_specs=[
                pl.BlockSpec((tm, tk), lambda i, j, k: (i, k)),   # X row tile
                pl.BlockSpec((tk, tn), lambda i, j, k: (k, j)),   # W tile
            ],
            out_specs=pl.BlockSpec((tm, tn), lambda i, j, k: (i, j)),
            scratch_shapes=[pltpu.VMEM((tm, tn), jnp.float32)],
        ),
        compiler_params=pltpu.CompilerParams(
            dimension_semantics=("parallel", "parallel", "arbitrary"),
            vmem_limit_bytes=VMEM_LIMIT_BYTES),
    )(x, w)


# ---- fused SAGE layer kernel: out = relu?( (A01 @ Z_neigh)/deg + H_dst @ W_self + b ) ----
# Grid: (dst tiles [parallel], src reduction tiles [arbitrary]); f32 VMEM accumulator.

def _sage_layer_kernel(a_ref, z_ref, hd_ref, ws_ref, b_ref, deg_ref, o_ref,
                       acc_ref, *, apply_relu):
    k = pl.program_id(1)

    @pl.when(k == 0)
    def _():
        acc_ref[...] = jnp.zeros_like(acc_ref)

    # mean-aggregation numerator: raw 0/1 adjacency tile @ Z_neigh chunk (bf16 MXU, f32 acc)
    acc_ref[...] += jnp.dot(a_ref[...], z_ref[...],
                            preferred_element_type=jnp.float32)

    @pl.when(k == pl.num_programs(1) - 1)
    def _():
        # 1/deg normalization kept in f32 (EUP reciprocal rides a free slot);
        # padded dst rows have deg 0 -> clamp to 1, they are sliced off later.
        inv_deg = pl.reciprocal(jnp.maximum(deg_ref[...], 1.0), approx=True)
        out = acc_ref[...] * inv_deg
        # fused self path: H_dst @ W_self + bias (dst nodes = first rows of H_src)
        out = out + jnp.dot(hd_ref[...], ws_ref[...],
                            preferred_element_type=jnp.float32) + b_ref[...]
        if apply_relu:
            out = jnp.maximum(out, 0.0)
        o_ref[...] = out.astype(o_ref.dtype)


def sage_layer(a01, deg, h_src, z_neigh, w_self, bias_row, *, apply_relu, out_dtype):
    n_dst, n_src = a01.shape
    fout = z_neigh.shape[1]
    fin = h_src.shape[1]
    assert w_self.shape == (fin, fout) and deg.shape == (n_dst, 1)

    tile_m = _pick_tile_m(n_dst)
    # keep Z_neigh fully resident (single reduction step) if it fits the VMEM budget,
    # otherwise use a large (512) reduction tile so per-step compute hides the DMA.
    if n_src * fout * z_neigh.dtype.itemsize <= Z_RESIDENT_BUDGET:
        tile_k = n_src
    else:
        tile_k = _fit_tile(n_src, 512)

    kernel = functools.partial(_sage_layer_kernel, apply_relu=apply_relu)
    return pl.pallas_call(
        kernel,
        out_shape=jax.ShapeDtypeStruct((n_dst, fout), out_dtype),
        grid_spec=pltpu.PrefetchScalarGridSpec(
            num_scalar_prefetch=0,
            grid=(n_dst // tile_m, n_src // tile_k),
            in_specs=[
                pl.BlockSpec((tile_m, tile_k), lambda i, k: (i, k)),  # raw 0/1 A tile
                pl.BlockSpec((tile_k, fout), lambda i, k: (k, 0)),    # Z_neigh chunk
                pl.BlockSpec((tile_m, fin), lambda i, k: (i, 0)),     # H_dst tile
                pl.BlockSpec((fin, fout), lambda i, k: (0, 0)),       # W_self (invariant)
                pl.BlockSpec((1, fout), lambda i, k: (0, 0)),         # bias row (f32)
                pl.BlockSpec((tile_m, 1), lambda i, k: (i, 0)),       # in-degree col (f32)
            ],
            out_specs=pl.BlockSpec((tile_m, fout), lambda i, k: (i, 0)),
            scratch_shapes=[pltpu.VMEM((tile_m, fout), jnp.float32)],
        ),
        compiler_params=pltpu.CompilerParams(
            dimension_semantics=("parallel", "arbitrary"),
            vmem_limit_bytes=VMEM_LIMIT_BYTES),
    )(a01, z_neigh, h_src, w_self, bias_row, deg)


# ------------------------------ prep (hoisted) ------------------------------

def prepare_params(params, *, compute_dtype=jnp.bfloat16):
    """Pad/cast weights ONCE (outside the per-forward hot path)."""
    prepped = []
    for w_self, w_neigh, bias in params:
        fin, fout = w_self.shape
        fin_p, fout_p = _round_up(fin, LANE), _round_up(fout, LANE)
        prepped.append(dict(
            w_self=_pad2d(w_self, fin_p, fout_p).astype(compute_dtype),
            w_neigh=_pad2d(w_neigh, fin_p, fout_p).astype(compute_dtype),
            bias=jnp.pad(bias, (0, fout_p - fout)).reshape(1, fout_p).astype(jnp.float32),
            fout=fout))
    return prepped


def prepare_blocks(blocks, *, compute_dtype=jnp.bfloat16):
    """Per sampled block (done at sampling time): pad the raw 0/1 adjacency (exact in
    bf16) and compute the f32 in-degree column. No row-normalization pass in XLA."""
    prepped = []
    for adj, n_dst in blocks:
        nd, ns = adj.shape
        nd_p, ns_p = _round_up(nd, LANE), _round_up(ns, LANE)
        deg = jnp.sum(adj, axis=1, keepdims=True).astype(jnp.float32)  # exact small ints
        prepped.append(dict(
            a01=_pad2d(adj, nd_p, ns_p).astype(compute_dtype),
            deg=_pad2d(deg, nd_p, 1),
            n_dst=n_dst))
    return prepped


# ------------------------------ full SAGE forward ------------------------------

def sage_forward(prepped_params, prepped_blocks, x, *, compute_dtype=jnp.bfloat16):
    """Two SAGEConv('mean') layers; ReLU + Dropout(identity) between them."""
    n_layers = len(prepped_params)
    n_src0, fin0 = x.shape
    h = _pad2d(x, _round_up(n_src0, LANE), _round_up(fin0, LANE)).astype(compute_dtype)

    n_dst_final = fout_final = None
    for l, (p, blk) in enumerate(zip(prepped_params, prepped_blocks)):
        last = (l == n_layers - 1)
        # re-associated neighbor path: Z_neigh = H_src @ W_neigh (once per layer, no bias)
        z_neigh = proj_matmul(h, p["w_neigh"], out_dtype=compute_dtype)
        # fused mean-aggregate + self path + bias (+ ReLU between layers)
        h = sage_layer(blk["a01"], blk["deg"], h, z_neigh, p["w_self"], p["bias"],
                       apply_relu=not last,
                       out_dtype=jnp.float32 if last else compute_dtype)
        # Dropout(0.5): eval-mode identity (see TODO at top).
        # NOTE: padded dst rows pick up bias (then ReLU); harmless because the next
        # layer's A01 has zero columns for them and the final slice drops them.
        n_dst_final, fout_final = blk["n_dst"], p["fout"]

    return h[:n_dst_final, :fout_final].astype(jnp.float32)


def _ref_forward(params, blocks, x):
    h = x
    n_layers = len(params)
    for l, (adj, n_dst) in enumerate(blocks):
        w_self, w_neigh, bias = params[l]
        deg = jnp.maximum(jnp.sum(adj, axis=1, keepdims=True), 1.0)
        out = h[:n_dst] @ w_self + ((adj @ h) / deg) @ w_neigh + bias
        if l != n_layers - 1:
            out = jnp.maximum(out, 0.0)
        h = out
    return h


if __name__ == "__main__":
    in_feats, n_hidden, n_classes = 16, 32, 8
    n_src, n_dst1, n_dst2 = 64, 32, 16

    key = jax.random.PRNGKey(0)
    k_x, k_a1, k_a2, k_w = jax.random.split(key, 4)

    # node features for the layer-1 source nodes
    x = jax.random.normal(k_x, (n_src, in_feats), dtype=jnp.float32)

    # synthetic sampled blocks: RAW dense 0/1 adjacency (~25% density)
    adj1 = (jax.random.uniform(k_a1, (n_dst1, n_src)) < 0.25).astype(jnp.float32)
    adj2 = (jax.random.uniform(k_a2, (n_dst2, n_dst1)) < 0.25).astype(jnp.float32)
    blocks = [(adj1, n_dst1), (adj2, n_dst2)]

    # deterministic parameter init matching dgl.nn.SAGEConv('mean') shapes:
    #   fc_self: (in, out), fc_neigh: (in, out), shared bias: (out,)
    def init_layer(k, fin, fout):
        k1, k2 = jax.random.split(k)
        scale = 1.0 / np.sqrt(fin)
        w_self = jax.random.uniform(k1, (fin, fout), minval=-scale, maxval=scale,
                                    dtype=jnp.float32)
        w_neigh = jax.random.uniform(k2, (fin, fout), minval=-scale, maxval=scale,
                                     dtype=jnp.float32)
        bias = jnp.zeros((fout,), dtype=jnp.float32)
        return w_self, w_neigh, bias

    kw1, kw2 = jax.random.split(k_w)
    params = [init_layer(kw1, in_feats, n_hidden),
              init_layer(kw2, n_hidden, n_classes)]

    # hoisted prep: pad/cast params and blocks once (bf16 MXU operands)
    pp = prepare_params(params, compute_dtype=jnp.bfloat16)
    pb = prepare_blocks(blocks, compute_dtype=jnp.bfloat16)

    out = sage_forward(pp, pb, x, compute_dtype=jnp.bfloat16)
    out = jax.block_until_ready(out)

    ref = _ref_forward(params, blocks, x)
    assert out.shape == (n_dst2, n_classes)
    # bf16 MXU operands (f32 accumulation) + approx EUP reciprocal => ~1% tolerance.
    np.testing.assert_allclose(np.asarray(out), np.asarray(ref), rtol=3e-2, atol=3e-2)

    print("KERNEL_OK")
</pallas_src>

<mosaic_0001>
module attributes {stable_mosaic.version = 11 : i64} {
  func.func @_proj_kernel(%arg0: i32, %arg1: i32, %arg2: i32, %arg3: memref<128x128xbf16, #tpu.memory_space<vmem>>, %arg4: memref<128x128xbf16, #tpu.memory_space<vmem>>, %arg5: memref<128x128xbf16, #tpu.memory_space<vmem>>, %arg6: memref<128x128xf32, #tpu.memory_space<vmem>>) attributes {dimension_semantics = [#tpu.dimension_semantics<parallel>, #tpu.dimension_semantics<parallel>, #tpu.dimension_semantics<arbitrary>], iteration_bounds = array<i64: 1, 1, 1>, scalar_prefetch = 0 : i64, scratch_operands = 1 : i64, tpu.core_type = #tpu.core_type<tc>, window_params = [{transform_indices = @transform_0, window_bounds = array<i64: 128, 128>}, {transform_indices = @transform_1, window_bounds = array<i64: 128, 128>}, {transform_indices = @transform_2, window_bounds = array<i64: 128, 128>}]} {
    %c0_i32 = arith.constant 0 : i32
    %0 = arith.cmpi eq, %arg2, %c0_i32 : i32
    %1 = arith.extui %0 : i1 to i32
    %c0_i32_0 = arith.constant 0 : i32
    %2 = arith.cmpi ne, %1, %c0_i32_0 : i32
    scf.if %2 {
      %cst_10 = arith.constant 0.000000e+00 : f32
      %12 = vector.broadcast %cst_10 : f32 to vector<128x128xf32>
      %c0_11 = arith.constant 0 : index
      %c0_12 = arith.constant 0 : index
      %13 = vector.load %arg6[%c0_11, %c0_12] : memref<128x128xf32, #tpu.memory_space<vmem>>, vector<128x128xf32>
      tpu.vector_store %arg6[%c0_11, %c0_12], %12 {strides = array<i32>} : memref<128x128xf32, #tpu.memory_space<vmem>>, vector<128x128xf32>,
    } else {
    }
    %c0 = arith.constant 0 : index
    %c0_1 = arith.constant 0 : index
    %3 = vector.load %arg6[%c0, %c0_1] : memref<128x128xf32, #tpu.memory_space<vmem>>, vector<128x128xf32>
    %c0_2 = arith.constant 0 : index
    %c0_3 = arith.constant 0 : index
    %4 = vector.load %arg3[%c0_2, %c0_3] : memref<128x128xbf16, #tpu.memory_space<vmem>>, vector<128x128xbf16>
    %c0_4 = arith.constant 0 : index
    %c0_5 = arith.constant 0 : index
    %5 = vector.load %arg4[%c0_4, %c0_5] : memref<128x128xbf16, #tpu.memory_space<vmem>>, vector<128x128xbf16>
    %cst = arith.constant dense<0.000000e+00> : vector<128x128xf32>
    %6 = tpu.matmul %4, %5, %cst {dimension_numbers = #tpu.dot_dimension_numbers<[1], [0], [0], [1], [0, 0, 1, 1], [], []>} : vector<128x128xbf16>, vector<128x128xbf16>, vector<128x128xf32> -> vector<128x128xf32>
    %7 = arith.addf %3, %6 : vector<128x128xf32>
    %c0_6 = arith.constant 0 : index
    %c0_7 = arith.constant 0 : index
    %8 = vector.load %arg6[%c0_6, %c0_7] : memref<128x128xf32, #tpu.memory_space<vmem>>, vector<128x128xf32>
    tpu.vector_store %arg6[%c0_6, %c0_7], %7 {strides = array<i32>} : memref<128x128xf32, #tpu.memory_space<vmem>>, vector<128x128xf32>,
    %c0_i32_8 = arith.constant 0 : i32
    %9 = arith.cmpi eq, %arg2, %c0_i32_8 : i32
    %10 = arith.extui %9 : i1 to i32
    %c0_i32_9 = arith.constant 0 : i32
    %11 = arith.cmpi ne, %10, %c0_i32_9 : i32
    scf.if %11 {
      %c0_10 = arith.constant 0 : index
      %c0_11 = arith.constant 0 : index
      %12 = vector.load %arg6[%c0_10, %c0_11] : memref<128x128xf32, #tpu.memory_space<vmem>>, vector<128x128xf32>
      %13 = arith.truncf %12 : vector<128x128xf32> to vector<128x128xbf16>
      %c0_12 = arith.constant 0 : index
      %c0_13 = arith.constant 0 : index
      %14 = vector.load %arg5[%c0_12, %c0_13] : memref<128x128xbf16, #tpu.memory_space<vmem>>, vector<128x128xbf16>
      tpu.vector_store %arg5[%c0_12, %c0_13], %13 {strides = array<i32>} : memref<128x128xbf16, #tpu.memory_space<vmem>>, vector<128x128xbf16>,
    } else {
    }
    return
  }
  func.func @transform_0(%arg0: i32, %arg1: i32, %arg2: i32) -> (i32, i32) {
    %c0_i32 = arith.constant 0 : i32
    return %arg0, %arg2 : i32, i32
  }
  func.func @transform_1(%arg0: i32, %arg1: i32, %arg2: i32) -> (i32, i32) {
    %c0_i32 = arith.constant 0 : i32
    return %arg2, %arg1 : i32, i32
  }
  func.func @transform_2(%arg0: i32, %arg1: i32, %arg2: i32) -> (i32, i32) {
    %c0_i32 = arith.constant 0 : i32
    return %arg0, %arg1 : i32, i32
  }
}

</mosaic_0001>

<bundles_post_ra>
// kernel: tpu_custom_call.1
= control target key start
LH: loop header
LB: loop body
LE: loop exit
PB: predicated region body
PF: predicated region fallthrough
CT: control target
= control target key end

     0   :  { %7 = vsyncpa [#allocation4], 0  ;;  %s768_s0 = inlined_call_operand.hbm [shape: bf16[128,128], index: 0, kind: input, shape index: {}]   ;;  %s769_s1 = inlined_call_operand.hbm [shape: bf16[128,128], index: 1, kind: input, shape index: {}]   ;;  %s770_s2 = inlined_call_operand.hbm [shape: bf16[128,128], index: 2, kind: output, shape index: {}]  }
   0x1   :  { %8 = vsyncpa [#allocation7], 0 }
   0x2   :  { %9 = vsyncpa [#allocation5], 0  ;;  %s703_s9 = smov [#allocation3]   ;;  %s631_s13 = scalar_lea.hbm %s768_s0, 1024 }
   0x3   :  { %s15_s10 = sshll.u32 %s703_s9, 4  ;;  %p632_p0 = scmp.ne.s32.totalorder %s768_s0, %s631_s13  ;;  %s16_s10 = int_to_ptr.vmem [resolvable:$true] %s15_s10 }
   0x4   :  { %p635_p1 = scmp.lt.u32.totalorder %s631_s13, %s768_s0 }
   0x6   :  { %p637_p2 = pnand %p635_p1, %p632_p0 }
   0x8   :  { %640 = shalt.err (!%p637_p2)
}
   0x9   :  { %s641_s18 = scalar_lea.vmem %s16_s10, 1024  ;;  %p646_p4 = scmp.lt.s32.totalorder %s16_s10, %s16_s10 }
   0xa   :  { %p642_p3 = scmp.ne.s32.totalorder %s16_s10, %s641_s18  ;;  %p647_p5 = scmp.lt.s32.totalorder %s641_s18, %s641_s18 }
   0xc   :  { %p648_p6 = por %p647_p5, %p646_p4 }
   0xe   :  { %p649_p7 = pnand %p648_p6, %p642_p3 }
  0x10   :  { %652 = shalt.err (!%p649_p7)
}
  0x11   :  { %s704_s19 = smov 64   ;;  %s705_s20 = smov 4  }
  0x12   :  { %21 = dma.hbm_to_vmem [thread:$0]  %s768_s0, 1024, %s16_s10, [#allocation4], %s704_s19, %s704_s19, %s705_s20  }
  0x13   :  { %s706_s23 = smov [#allocation6]   ;;  %s653_s27 = scalar_lea.hbm %s769_s1, 1024 }
  0x14   :  { %s27_s24 = sshll.u32 %s706_s23, 4  ;;  %p654_p8 = scmp.ne.s32.totalorder %s769_s1, %s653_s27  ;;  %s28_s24 = int_to_ptr.vmem [resolvable:$true] %s27_s24 }
  0x15   :  { %p657_p9 = scmp.lt.u32.totalorder %s653_s27, %s769_s1 }
  0x17   :  { %p659_p10 = pnand %p657_p9, %p654_p8 }
  0x19   :  { %662 = shalt.err (!%p659_p10)
}
  0x1a   :  { %s663_s4 = scalar_lea.vmem %s28_s24, 1024  ;;  %p668_p12 = scmp.lt.s32.totalorder %s28_s24, %s28_s24 }
  0x1b   :  { %p664_p11 = scmp.ne.s32.totalorder %s28_s24, %s663_s4  ;;  %p669_p13 = scmp.lt.s32.totalorder %s663_s4, %s663_s4 }
  0x1d   :  { %p670_p0 = por %p669_p13, %p668_p12 }
  0x1f   :  { %p671_p1 = pnand %p670_p0, %p664_p11 }
  0x21   :  { %674 = shalt.err (!%p671_p1)
}
  0x22   :  { %33 = dma.hbm_to_vmem [thread:$0]  %s769_s1, 1024, %s28_s24, [#allocation7], %s704_s19, %s704_s19, %s705_s20  }
  0x23   :  { %697 = dma.done.wait [#allocation4], 1024  }
  0x24   :  { %698 = vsyncadd [#allocation4], 4294966272 }
  0x25   :  { %699 = dma.done.wait [#allocation7], 1024  }
  0x26   :  { %700 = vsyncadd [#allocation7], 4294966272  ;;  %v615_v0 = vld [vmem:[#allocation6] sm:$0xff]   ;;  %v616_v1 = vld [vmem:[#allocation6 + $0x8] sm:$0xff]   ;;  %s707_s1 = smov [#allocation8]  }
  0x27   :  { %562 = vmatprep.subr.bf16.mxu0 %v615_v0  ;;  %594 = vmatprep.subr.bf16.mxu1 %v615_v0  ;;  %v617_v2 = vld [vmem:[#allocation6 + $0x10] sm:$0xff]   ;;  %v618_v3 = vld [vmem:[#allocation6 + $0x18] sm:$0xff]   ;;  %v623_v4 = vld [vmem:[#allocation3] sm:$0xff]   ;;  %s438_s6 = sshll.u32 %s707_s1, 4  ;;  %s439_s6 = int_to_ptr.vmem [resolvable:$true] %s438_s6 }
  0x28   :  { %563 = vmatpush3.bf16.msra.mxu0 %v615_v0  ;;  %602 = vmatpush3.bf16.msra.mxu1 %v615_v0  ;;  %v624_v5 = vld [vmem:[#allocation3 + $0x20] sm:$0xff]   ;;  %v620_v7 = vld [vmem:[#allocation6 + $0x28] sm:$0xff]   ;;  %v621_v8 = vld [vmem:[#allocation6 + $0x30] sm:$0xff]   ;;  %s675_s7 = scalar_lea.vmem %s439_s6, 1024  ;;  %p680_p3 = scmp.lt.s32.totalorder %s439_s6, %s439_s6 }
  0x29   :  { %564 = vmatprep.subr.bf16.mxu0 %v616_v1  ;;  %595 = vmatprep.subr.bf16.mxu1 %v616_v1  ;;  %v619_v6 = vld [vmem:[#allocation6 + $0x20] sm:$0xff]   ;;  %v622_v9 = vld [vmem:[#allocation6 + $0x38] sm:$0xff]   ;;  %v625_v10 = vld [vmem:[#allocation3 + $0x8] sm:$0xff]   ;;  %p676_p2 = scmp.ne.s32.totalorder %s439_s6, %s675_s7  ;;  %p681_p4 = scmp.lt.s32.totalorder %s675_s7, %s675_s7 }
  0x2a   :  { %578 = vmatprep.mubr.bf16.mxu0 %v623_v4  ;;  %586 = vmatprep.mubr.bf16.mxu1 %v624_v5  ;;  %v626_v11 = vld [vmem:[#allocation3 + $0x28] sm:$0xff]   ;;  %v627_v12 = vld [vmem:[#allocation3 + $0x10] sm:$0xff]   ;;  %v629_v14 = vld [vmem:[#allocation3 + $0x18] sm:$0xff]  }
  0x2b   :  { %v628_v13 = vld [vmem:[#allocation3 + $0x30] sm:$0xff]   ;;  %v630_v15 = vld [vmem:[#allocation3 + $0x38] sm:$0xff]   ;;  %p682_p5 = por %p681_p4, %p680_p3 }
  0x2c   :  { %565 = vmatpush3.bf16.msra.mxu0 %v616_v1  ;;  %603 = vmatpush3.bf16.msra.mxu1 %v616_v1 }
  0x2d   :  { %566 = vmatprep.subr.bf16.mxu0 %v617_v2  ;;  %596 = vmatprep.subr.bf16.mxu1 %v617_v2  ;;  %p683_p6 = pnand %p682_p5, %p676_p2 }
  0x30   :  { %567 = vmatpush3.bf16.msra.mxu0 %v617_v2  ;;  %604 = vmatpush3.bf16.msra.mxu1 %v617_v2 }
  0x31   :  { %568 = vmatprep.subr.bf16.mxu0 %v618_v3  ;;  %597 = vmatprep.subr.bf16.mxu1 %v618_v3 }
  0x34   :  { %569 = vmatpush3.bf16.msra.mxu0 %v618_v3  ;;  %605 = vmatpush3.bf16.msra.mxu1 %v618_v3 }
  0x35   :  { %570 = vmatprep.subr.bf16.mxu0 %v619_v6  ;;  %598 = vmatprep.subr.bf16.mxu1 %v619_v6 }
  0x38   :  { %571 = vmatpush3.bf16.msra.mxu0 %v619_v6  ;;  %606 = vmatpush3.bf16.msra.mxu1 %v619_v6 }
  0x39   :  { %572 = vmatprep.subr.bf16.mxu0 %v620_v7  ;;  %599 = vmatprep.subr.bf16.mxu1 %v620_v7 }
  0x3c   :  { %573 = vmatpush3.bf16.msra.mxu0 %v620_v7  ;;  %607 = vmatpush3.bf16.msra.mxu1 %v620_v7 }
  0x3d   :  { %574 = vmatprep.subr.bf16.mxu0 %v621_v8  ;;  %600 = vmatprep.subr.bf16.mxu1 %v621_v8 }
  0x40   :  { %575 = vmatpush3.bf16.msra.mxu0 %v621_v8  ;;  %608 = vmatpush3.bf16.msra.mxu1 %v621_v8 }
  0x41   :  { %576 = vmatprep.subr.bf16.mxu0 %v622_v9  ;;  %601 = vmatprep.subr.bf16.mxu1 %v622_v9 }
  0x44   :  { %577 = vmatpush3.bf16.msra.mxu0 %v622_v9  ;;  %609 = vmatpush3.bf16.msra.mxu1 %v622_v9 }
  0x47   :  { %579 = vmatmul.mubr.bf16.vlgmr.msra.gmra.mrb[0].mxu0 %v625_v10  ;;  %587 = vmatmul.mubr.bf16.vlgmr.msra.gmra.mrb[0].mxu1 %v626_v11 }
  0x48   :  { %582 = vmatprep.mubr.bf16.mxu0 %v627_v12  ;;  %590 = vmatprep.mubr.bf16.mxu1 %v628_v13 }
  0x4f   :  { %583 = vmatmul.mubr.bf16.gmra.mrb[4].mxu0 %v629_v14  ;;  %591 = vmatmul.mubr.bf16.gmra.mrb[4].mxu1 %v630_v15 }
 0x11a   :  { %v580_v16 = vpop.f32.mrb[0].mxu0  ;;  %v588_v17 = vpop.f32.mrb[0].mxu1 }
 0x11b   :  { %v239_v18 = vpop.f32.mrb[1].mxu0  ;;  %v271_v19 = vpop.f32.mrb[1].mxu1 }
 0x11c   :  { %v581_v20 = vpop.f32.mrb[2].mxu0  ;;  %v589_v21 = vpop.f32.mrb[2].mxu1 }
 0x11d   :  { %v507_v22 = vpack.c.bf16 %v581_v20, %v580_v16  ;;  %v527_v23 = vpack.c.bf16 %v589_v21, %v588_v17  ;;  %v242_v24 = vpop.f32.mrb[3].mxu0  ;;  %v274_v25 = vpop.f32.mrb[3].mxu1 }
 0x11e   :  { %v502_v26 = vpack.c.bf16 %v242_v24, %v239_v18  ;;  %v522_v27 = vpack.c.bf16 %v274_v25, %v271_v19 }
 0x11f   :  { %539 = vst [vmem:[#allocation8 + $0x8] sm:$0xff] %v507_v22   ;;  %543 = vst [vmem:[#allocation8 + $0x28] sm:$0xff] %v527_v23  }
 0x120   :  { %503 = vst [vmem:[#allocation8] sm:$0xff] %v502_v26   ;;  %542 = vst [vmem:[#allocation8 + $0x20] sm:$0xff] %v522_v27  }
 0x122   :  { %v584_v28 = vpop.f32.mrb[4].mxu0  ;;  %v592_v29 = vpop.f32.mrb[4].mxu1 }
 0x123   :  { %v255_v30 = vpop.f32.mrb[5].mxu0  ;;  %v287_v31 = vpop.f32.mrb[5].mxu1 }
 0x124   :  { %v585_v32 = vpop.f32.mrb[6].mxu0  ;;  %v593_v33 = vpop.f32.mrb[6].mxu1 }
 0x125   :  { %v517_v34 = vpack.c.bf16 %v585_v32, %v584_v28  ;;  %v537_v35 = vpack.c.bf16 %v593_v33, %v592_v29  ;;  %v258_v36 = vpop.f32.mrb[7].mxu0  ;;  %v290_v37 = vpop.f32.mrb[7].mxu1 }
 0x126   :  { %v512_v38 = vpack.c.bf16 %v258_v36, %v255_v30  ;;  %v532_v39 = vpack.c.bf16 %v290_v37, %v287_v31 }
 0x127   :  { %541 = vst [vmem:[#allocation8 + $0x18] sm:$0xff] %v517_v34   ;;  %545 = vst [vmem:[#allocation8 + $0x38] sm:$0xff] %v537_v35  }
 0x128   :  { %540 = vst [vmem:[#allocation8 + $0x10] sm:$0xff] %v512_v38   ;;  %544 = vst [vmem:[#allocation8 + $0x30] sm:$0xff] %v532_v39  }
 0x129   :  { %686 = shalt.err (!%p683_p6)
}
 0x12a   :  { %s687_s10 = scalar_lea.hbm %s770_s2, 1024 }
 0x12b   :  { %p688_p7 = scmp.ne.s32.totalorder %s770_s2, %s687_s10  ;;  %p691_p8 = scmp.lt.u32.totalorder %s687_s10, %s770_s2 }
 0x12d   :  { %p693_p9 = pnand %p691_p8, %p688_p7 }
 0x12f   :  { %696 = shalt.err (!%p693_p9)
}
 0x130   :  { %444 = dma.vmem_to_hbm [thread:$0]  %s439_s6, 1024, %s770_s2, [#allocation5], %s704_s19, %s704_s19, %s705_s20  }
 0x131   :  { %701 = dma.done.wait [#allocation5], 1024  }
 0x132   :  { %702 = vsyncadd [#allocation5], 4294966272 }
 0x133   :  { %448 = vsyncpa [#allocation4], 1 }
 0x134   :  { %449 = vsyncpa [#allocation7], 1 }
 0x135   :  { %450 = vsyncpa [#allocation5], 1 }

</bundles_post_ra>
